<compile_context>
chip_gen: v6e
topology: v6e:2x2x1
jax: 0.10.0
libtpu: 0.0.40
codegen_flags: <defaults>
</compile_context>

<pallas_src>
import functools

import jax
import jax.numpy as jnp
from jax.experimental import pallas as pl
from jax.experimental.pallas import tpu as pltpu

_LANE = 128        # hidden feature dims are zero-padded to this (once, at prep time)
_SUBLANE = 8       # batch tiles are multiples of this
_MAX_TILE_B = 256  # per-grid-step batch tile cap (>=2 steps per TensorCore at batch>=256)


def _round_up(n, m):
    return ((n + m - 1) // m) * m


def _cdiv(a, b):
    return -(-a // b)


# ----------------------------------------------------------------------------
# Kernels: one batch tile per grid step; weights/biases are VMEM-resident.
# ----------------------------------------------------------------------------

def _mlp1_kernel(x_ref, w1_ref, b1_ref, w2_ref, b2_ref, o_ref):
    # Layer 1: K = state_dim (tiny, unpadded -> x DMA stays narrow). Do this
    # dot in f32 (w1 is a few KiB); accumulation is f32 either way.
    h = jnp.dot(x_ref[...].astype(jnp.float32), w1_ref[...].astype(jnp.float32),
                preferred_element_type=jnp.float32)
    h = jnp.maximum(h + b1_ref[...], 0.0)                 # bias + ReLU in f32 (VPU)
    # Layer 2: lane-dense K = padded hidden; cast the activation operand to the
    # stored weight dtype (bf16 on v6e/v7x), accumulate in f32.
    q = jnp.dot(h.astype(w2_ref.dtype), w2_ref[...],
                preferred_element_type=jnp.float32)
    a = o_ref.shape[-1]                                   # true actions_dim
    o_ref[...] = (q[:, :a] + b2_ref[...]).astype(o_ref.dtype)


def _mlp2_kernel(x_ref, w1_ref, b1_ref, w2_ref, b2_ref, w3_ref, b3_ref, o_ref):
    h = jnp.dot(x_ref[...].astype(jnp.float32), w1_ref[...].astype(jnp.float32),
                preferred_element_type=jnp.float32)
    h = jnp.maximum(h + b1_ref[...], 0.0)
    h = jnp.dot(h.astype(w2_ref.dtype), w2_ref[...],
                preferred_element_type=jnp.float32)
    h = jnp.maximum(h + b2_ref[...], 0.0)
    q = jnp.dot(h.astype(w3_ref.dtype), w3_ref[...],
                preferred_element_type=jnp.float32)
    a = o_ref.shape[-1]
    o_ref[...] = (q[:, :a] + b3_ref[...]).astype(o_ref.dtype)


# ----------------------------------------------------------------------------
# One-time parameter preparation (padding + dtype) -- NOT inside the forward.
# ----------------------------------------------------------------------------

def prepare_params(raw_params, nb_hidden, compute_dtype=jnp.float32):
    """Pad/cast raw params ONCE and carry the result in the param pytree.

    Raw layout (torch.nn.Linear transposed): w_i (in, out), b_i (out,) or (1, out).
    Hidden widths are zero-padded to multiples of 128 lanes (inert through
    matmul + bias + ReLU); state_dim and actions_dim keep their true sizes.
    Weights are cast to `compute_dtype` (bf16 recommended on v6e/v7x); biases
    stay f32 so the bias add / ReLU run in f32 on every generation (incl. v5e).
    """
    if nb_hidden not in (1, 2):
        raise RuntimeError(
            "Unsupported number of hidden layers for QNet, specify 1 or 2.")
    n_layers = nb_hidden + 1
    prepared = {}
    in_pad = raw_params["w1"].shape[0]          # = state_dim: kept at true size
    for i in range(1, n_layers + 1):
        w = jnp.asarray(raw_params[f"w{i}"])
        b = jnp.asarray(raw_params[f"b{i}"]).reshape(1, -1)   # accept (out,) or (1,out)
        d_in, d_out = w.shape
        out_pad = _round_up(d_out, _LANE)
        w = jnp.pad(w, ((0, in_pad - d_in), (0, out_pad - d_out)))
        prepared[f"w{i}"] = w.astype(compute_dtype)
        if i == n_layers:
            prepared[f"b{i}"] = b.astype(jnp.float32)          # keeps true actions_dim
        else:
            prepared[f"b{i}"] = jnp.pad(
                b, ((0, 0), (0, out_pad - d_out))).astype(jnp.float32)
        in_pad = out_pad
    return prepared


# ----------------------------------------------------------------------------
# Forward: tile over batch, call pallas_call.
# ----------------------------------------------------------------------------

@functools.partial(jax.jit, static_argnames=("nb_hidden",))
def nnet_forward(x, params, *, nb_hidden):
    """Pallas forward for NNet. `params` must come from `prepare_params`."""
    batch, state_dim = x.shape
    if nb_hidden == 1:
        names = ("w1", "b1", "w2", "b2")
        kernel = _mlp1_kernel
    elif nb_hidden == 2:
        names = ("w1", "b1", "w2", "b2", "w3", "b3")
        kernel = _mlp2_kernel
    else:
        raise RuntimeError(
            "Unsupported number of hidden layers for QNet, specify 1 or 2.")
    operands = [params[n] for n in names]
    if operands[0].shape[0] != state_dim:
        raise ValueError("params were prepared for a different state_dim")
    actions_dim = operands[-1].shape[-1]        # last bias keeps the true actions_dim

    # Balanced batch tiling: tile <= 256 rows, multiple of 8 sublanes, so large
    # batches give >= 4 grid steps (>= 2 per TensorCore) and no tile is mostly
    # padding.
    n_tiles = max(_cdiv(batch, _MAX_TILE_B), min(4, _cdiv(batch, 64)))
    tile_b = _round_up(_cdiv(batch, n_tiles), _SUBLANE)
    n_tiles = _cdiv(batch, tile_b)
    batch_p = n_tiles * tile_b

    x_p = x if batch_p == batch else jnp.pad(x, ((0, batch_p - batch), (0, 0)))

    # x / out are tiled over the batch grid (last dim = full array dim, so the
    # narrow state_dim / actions_dim blocks are legal). Weights & biases use a
    # constant block index -> DMA'd once, VMEM-resident across all grid steps.
    in_specs = [pl.BlockSpec((tile_b, state_dim), lambda i: (i, 0))]
    in_specs += [pl.BlockSpec(op.shape, lambda i: (0, 0)) for op in operands]

    out = pl.pallas_call(
        kernel,
        grid=(n_tiles,),
        out_shape=jax.ShapeDtypeStruct((batch_p, actions_dim), x.dtype),
        in_specs=in_specs,
        out_specs=pl.BlockSpec((tile_b, actions_dim), lambda i: (i, 0)),
        compiler_params=pltpu.CompilerParams(
            dimension_semantics=("parallel",),   # shard the batch grid across TCs (v7x)
        ),
    )(x_p, *operands)

    return out if batch_p == batch else out[:batch]


# ----------------------------------------------------------------------------
# Raw parameter init (mimics torch.nn.Linear: U(-1/sqrt(fan_in), 1/sqrt(fan_in)))
# and a pure-JAX reference.
# ----------------------------------------------------------------------------

def init_params(key, state_dim, actions_dim, nb_hidden, hidden_dim):
    dims = ([state_dim, hidden_dim, actions_dim] if nb_hidden == 1
            else [state_dim, hidden_dim, hidden_dim, actions_dim])
    params = {}
    for i, (d_in, d_out) in enumerate(zip(dims[:-1], dims[1:]), start=1):
        key, kw, kb = jax.random.split(key, 3)
        bound = 1.0 / (d_in ** 0.5)
        params[f"w{i}"] = jax.random.uniform(
            kw, (d_in, d_out), jnp.float32, -bound, bound)
        params[f"b{i}"] = jax.random.uniform(
            kb, (d_out,), jnp.float32, -bound, bound)
    return params


def nnet_forward_ref(x, params, nb_hidden):
    h = jnp.maximum(x @ params["w1"] + params["b1"], 0.0)
    if nb_hidden == 2:
        h = jnp.maximum(h @ params["w2"] + params["b2"], 0.0)
        return h @ params["w3"] + params["b3"]
    return h @ params["w2"] + params["b2"]


if __name__ == "__main__":
    key = jax.random.PRNGKey(0)
    state_dim, actions_dim, hidden_dim = 4, 2, 32   # CartPole-like shapes

    for nb_hidden in (1, 2):
        key, kp = jax.random.split(key)
        raw = init_params(kp, state_dim, actions_dim, nb_hidden, hidden_dim)

        params_f32 = prepare_params(raw, nb_hidden)                     # f32 weights
        params_bf16 = prepare_params(raw, nb_hidden, jnp.bfloat16)      # bf16 weights (v6e/v7x)

        for batch in (8, 513):       # single tile / multi-tile with uneven batch padding
            key, kx = jax.random.split(key)
            x = jax.random.normal(kx, (batch, state_dim), jnp.float32)
            ref = nnet_forward_ref(x, raw, nb_hidden)

            # Loose-ish tolerances: the XLA reference and the in-kernel MXU may
            # use different f32-matmul precision modes; real bugs are >> 1e-1.
            for params, tol in ((params_f32, 3e-2), (params_bf16, 1.5e-1)):
                out = jax.block_until_ready(
                    nnet_forward(x, params, nb_hidden=nb_hidden))
                if out.shape != (batch, actions_dim):
                    raise RuntimeError(
                        f"bad output shape {out.shape}, expected {(batch, actions_dim)}")
                if not jnp.allclose(out, ref, atol=tol, rtol=tol):
                    err = float(jnp.max(jnp.abs(out - ref)))
                    raise RuntimeError(
                        f"mismatch: nb_hidden={nb_hidden} batch={batch} "
                        f"wdtype={params['w2'].dtype} max|diff|={err}")

    print("KERNEL_OK")
</pallas_src>

<mosaic_0001>
module attributes {stable_mosaic.version = 11 : i64} {
  func.func @_mlp1_kernel(%arg0: i32, %arg1: memref<8x4xf32, #tpu.memory_space<vmem>>, %arg2: memref<4x128xf32, #tpu.memory_space<vmem>>, %arg3: memref<1x128xf32, #tpu.memory_space<vmem>>, %arg4: memref<128x128xf32, #tpu.memory_space<vmem>>, %arg5: memref<1x2xf32, #tpu.memory_space<vmem>>, %arg6: memref<8x2xf32, #tpu.memory_space<vmem>>) attributes {dimension_semantics = [#tpu.dimension_semantics<parallel>], iteration_bounds = array<i64: 1>, scalar_prefetch = 0 : i64, scratch_operands = 0 : i64, tpu.core_type = #tpu.core_type<tc>, window_params = [{transform_indices = @transform_0, window_bounds = array<i64: 8, 4>}, {pipeline_mode = #tpu.pipeline_mode<synchronous>, transform_indices = @transform_1, window_bounds = array<i64: 4, 128>}, {pipeline_mode = #tpu.pipeline_mode<synchronous>, transform_indices = @transform_2, window_bounds = array<i64: 1, 128>}, {pipeline_mode = #tpu.pipeline_mode<synchronous>, transform_indices = @transform_3, window_bounds = array<i64: 128, 128>}, {pipeline_mode = #tpu.pipeline_mode<synchronous>, transform_indices = @transform_4, window_bounds = array<i64: 1, 2>}, {transform_indices = @transform_5, window_bounds = array<i64: 8, 2>}]} {
    %c0 = arith.constant 0 : index
    %c0_0 = arith.constant 0 : index
    %0 = vector.load %arg1[%c0, %c0_0] : memref<8x4xf32, #tpu.memory_space<vmem>>, vector<8x4xf32>
    %c0_1 = arith.constant 0 : index
    %c0_2 = arith.constant 0 : index
    %1 = vector.load %arg2[%c0_1, %c0_2] : memref<4x128xf32, #tpu.memory_space<vmem>>, vector<4x128xf32>
    %cst = arith.constant dense<0.000000e+00> : vector<8x128xf32>
    %2 = tpu.matmul %0, %1, %cst {dimension_numbers = #tpu.dot_dimension_numbers<[1], [0], [0], [1], [0, 0, 1, 1], [], []>} : vector<8x4xf32>, vector<4x128xf32>, vector<8x128xf32> -> vector<8x128xf32>
    %c0_3 = arith.constant 0 : index
    %c0_4 = arith.constant 0 : index
    %3 = vector.load %arg3[%c0_3, %c0_4] : memref<1x128xf32, #tpu.memory_space<vmem>>, vector<1x128xf32>
    %4 = vector.broadcast %3 : vector<1x128xf32> to vector<8x128xf32>
    %5 = arith.addf %2, %4 : vector<8x128xf32>
    %cst_5 = arith.constant 0.000000e+00 : f32
    %6 = vector.broadcast %cst_5 : f32 to vector<8x128xf32>
    %7 = arith.maximumf %5, %6 : vector<8x128xf32>
    %c0_6 = arith.constant 0 : index
    %c0_7 = arith.constant 0 : index
    %8 = vector.load %arg4[%c0_6, %c0_7] : memref<128x128xf32, #tpu.memory_space<vmem>>, vector<128x128xf32>
    %cst_8 = arith.constant dense<0.000000e+00> : vector<8x128xf32>
    %9 = tpu.matmul %7, %8, %cst_8 {dimension_numbers = #tpu.dot_dimension_numbers<[1], [0], [0], [1], [0, 0, 1, 1], [], []>} : vector<8x128xf32>, vector<128x128xf32>, vector<8x128xf32> -> vector<8x128xf32>
    %10 = vector.extract_strided_slice %9 {offsets = [0, 0], sizes = [8, 2], strides = [1, 1]} : vector<8x128xf32> to vector<8x2xf32>
    %c0_9 = arith.constant 0 : index
    %c0_10 = arith.constant 0 : index
    %11 = vector.load %arg5[%c0_9, %c0_10] : memref<1x2xf32, #tpu.memory_space<vmem>>, vector<1x2xf32>
    %12 = vector.broadcast %11 : vector<1x2xf32> to vector<8x2xf32>
    %13 = arith.addf %10, %12 : vector<8x2xf32>
    %c0_11 = arith.constant 0 : index
    %c0_12 = arith.constant 0 : index
    %14 = vector.load %arg6[%c0_11, %c0_12] : memref<8x2xf32, #tpu.memory_space<vmem>>, vector<8x2xf32>
    tpu.vector_store %arg6[%c0_11, %c0_12], %13 {strides = array<i32>} : memref<8x2xf32, #tpu.memory_space<vmem>>, vector<8x2xf32>,
    return
  }
  func.func @transform_0(%arg0: i32) -> (i32, i32) {
    %c0_i32 = arith.constant 0 : i32
    %c0_i32_0 = arith.constant 0 : i32
    return %arg0, %c0_i32 : i32, i32
  }
  func.func @transform_1(%arg0: i32) -> (i32, i32) {
    %c0_i32 = arith.constant 0 : i32
    %c0_i32_0 = arith.constant 0 : i32
    %c0_i32_1 = arith.constant 0 : i32
    return %c0_i32, %c0_i32_0 : i32, i32
  }
  func.func @transform_2(%arg0: i32) -> (i32, i32) {
    %c0_i32 = arith.constant 0 : i32
    %c0_i32_0 = arith.constant 0 : i32
    %c0_i32_1 = arith.constant 0 : i32
    return %c0_i32, %c0_i32_0 : i32, i32
  }
  func.func @transform_3(%arg0: i32) -> (i32, i32) {
    %c0_i32 = arith.constant 0 : i32
    %c0_i32_0 = arith.constant 0 : i32
    %c0_i32_1 = arith.constant 0 : i32
    return %c0_i32, %c0_i32_0 : i32, i32
  }
  func.func @transform_4(%arg0: i32) -> (i32, i32) {
    %c0_i32 = arith.constant 0 : i32
    %c0_i32_0 = arith.constant 0 : i32
    %c0_i32_1 = arith.constant 0 : i32
    return %c0_i32, %c0_i32_0 : i32, i32
  }
  func.func @transform_5(%arg0: i32) -> (i32, i32) {
    %c0_i32 = arith.constant 0 : i32
    %c0_i32_0 = arith.constant 0 : i32
    return %arg0, %c0_i32 : i32, i32
  }
}

</mosaic_0001>

<bundles_post_ra>
// kernel: nnet_forward.1
= control target key start
LH: loop header
LB: loop body
LE: loop exit
PB: predicated region body
PF: predicated region fallthrough
CT: control target
= control target key end

     0   :  { %10 = vsyncpa [#allocation3], 0  ;;  %s313_s18 = smov [#allocation2]   ;;  %s366_s0 = inlined_call_operand.vmem [shape: f32[8,4], index: 0, kind: input, shape index: {}]   ;;  %s367_s1 = inlined_call_operand.vmem [shape: f32[4,128], index: 1, kind: input, shape index: {}]   ;;  %s368_s2 = inlined_call_operand.vmem [shape: f32[1,128], index: 2, kind: input, shape index: {}]   ;;  %s369_s3 = inlined_call_operand.hbm [shape: f32[128,128], index: 3, kind: input, shape index: {}]   ;;  %s370_s4 = inlined_call_operand.vmem [shape: f32[1,2], index: 4, kind: input, shape index: {}]   ;;  %s371_s5 = inlined_call_operand.vmem [shape: f32[8,2], index: 5, kind: output, shape index: {}]  }
   0x1   :  { %s22_s19 = sshll.u32 %s313_s18, 4  ;;  %s23_s19 = int_to_ptr.vmem [resolvable:$true] %s22_s19 }
   0x2   :  { %s299_s20 = scalar_lea.vmem %s23_s19, 2048  ;;  %p304_p1 = scmp.lt.s32.totalorder %s23_s19, %s23_s19 }
   0x3   :  { %p300_p0 = scmp.ne.s32.totalorder %s23_s19, %s299_s20  ;;  %p305_p2 = scmp.lt.s32.totalorder %s299_s20, %s299_s20 }
   0x5   :  { %p306_p3 = por %p305_p2, %p304_p1 }
   0x7   :  { %p307_p4 = pnand %p306_p3, %p300_p0 }
   0x9   :  { %310 = shalt.err (!%p307_p4)
}
   0xa   :  { %s314_s21 = smov 128   ;;  %s315_s22 = smov 8  }
   0xb   :  { %28 = dma.hbm_to_vmem [thread:$0]  %s369_s3, 2048, %s23_s19, [#allocation3], %s314_s21, %s314_s21, %s315_s22  }
   0xc   :  { %311 = dma.done.wait [#allocation3], 2048  }
   0xd   :  { %312 = vsyncadd [#allocation3], 4294965248  ;;  %v316_v0 = vmov 0.0   ;;  %vm317_vm0 = vmmov 0   ;;  %vm47_vm1 = vcmask 1043456   ;;  %vm43_vm2 = vcmask 31744  }
   0xe   :  { %246 = vmatprep.subr.mxu0 %v316_v0  ;;  %248 = vmatprep.mubr.msk.f32.mxu0 %vm317_vm0, %v316_v0  ;;  %v35_v1 = vld [vmem:[%s367_s1] sm:$0xf]  ;;  %v137_v3 = vld [vmem:[#allocation2 + $0x78] sm:$0xff]  ;;  %v136_v4 = vld [vmem:[#allocation2 + $0x70] sm:$0xff]  ;;  %vm216_vm3 = vcmask 15360  }
   0xf   :  { %251 = vmatprep.subr.mxu1 %v316_v0  ;;  %283 = vmatprep.mubr.msk.f32.mxu1 %vm317_vm0, %v316_v0  ;;  %v34_v2 = vld [vmem:[%s366_s0] sm:$0xff]  ;;  %v135_v5 = vld [vmem:[#allocation2 + $0x68] sm:$0xff]  ;;  %v133_v7 = vld [vmem:[#allocation2 + $0x58] sm:$0xff] }
  0x10   :  { %247 = vmatpush3.msk.msra.mxu0 %vm47_vm1, %v35_v1  ;;  %252 = vmatpush3.msra.mxu1 %v137_v3  ;;  %v134_v6 = vld [vmem:[#allocation2 + $0x60] sm:$0xff]  ;;  %v132_v8 = vld [vmem:[#allocation2 + $0x50] sm:$0xff]  ;;  %v131_v9 = vld [vmem:[#allocation2 + $0x48] sm:$0xff] }
  0x11   :  { %249 = vmatmul.mubr.msk.f32.vlgmr.msra.gmra.mxu0 %vm43_vm2, %v34_v2  ;;  %253 = vmatprep.subr.mxu1 %v316_v0  ;;  %v130_v10 = vld [vmem:[#allocation2 + $0x40] sm:$0xff]  ;;  %v129_v11 = vld [vmem:[#allocation2 + $0x38] sm:$0xff]  ;;  %v128_v12 = vld [vmem:[#allocation2 + $0x30] sm:$0xff] }
  0x12   :  { %254 = vmatpush3.msra.mxu1 %v136_v4  ;;  %v127_v13 = vld [vmem:[#allocation2 + $0x28] sm:$0xff]  ;;  %v126_v14 = vld [vmem:[#allocation2 + $0x20] sm:$0xff]  ;;  %v125_v15 = vld [vmem:[#allocation2 + $0x18] sm:$0xff] }
  0x13   :  { %255 = vmatprep.subr.mxu1 %v316_v0  ;;  %v124_v16 = vld [vmem:[#allocation2 + $0x10] sm:$0xff]  ;;  %v123_v17 = vld [vmem:[#allocation2 + $0x8] sm:$0xff]  ;;  %v122_v18 = vld [vmem:[#allocation2] sm:$0xff] }
  0x14   :  { %256 = vmatpush3.msra.mxu1 %v135_v5  ;;  %v223_v19 = vld [vmem:[%s368_s2] ss:$0 sm:$0xff] }
  0x15   :  { %257 = vmatprep.subr.mxu1 %v316_v0  ;;  %v226_v24 = vld [vmem:[%s370_s4] ss:$0 sm:$0xff] }
  0x16   :  { %258 = vmatpush3.msra.mxu1 %v134_v6 }
  0x17   :  { %259 = vmatprep.subr.mxu1 %v316_v0 }
  0x18   :  { %260 = vmatpush3.msra.mxu1 %v133_v7 }
  0x19   :  { %261 = vmatprep.subr.mxu1 %v316_v0 }
  0x1a   :  { %262 = vmatpush3.msra.mxu1 %v132_v8 }
  0x1b   :  { %263 = vmatprep.subr.mxu1 %v316_v0 }
  0x1c   :  { %264 = vmatpush3.msra.mxu1 %v131_v9 }
  0x1d   :  { %265 = vmatprep.subr.mxu1 %v316_v0 }
  0x1e   :  { %266 = vmatpush3.msra.mxu1 %v130_v10 }
  0x1f   :  { %267 = vmatprep.subr.mxu1 %v316_v0 }
  0x20   :  { %268 = vmatpush3.msra.mxu1 %v129_v11 }
  0x21   :  { %269 = vmatprep.subr.mxu1 %v316_v0 }
  0x22   :  { %270 = vmatpush3.msra.mxu1 %v128_v12 }
  0x23   :  { %271 = vmatprep.subr.mxu1 %v316_v0 }
  0x24   :  { %272 = vmatpush3.msra.mxu1 %v127_v13 }
  0x25   :  { %273 = vmatprep.subr.mxu1 %v316_v0 }
  0x26   :  { %274 = vmatpush3.msra.mxu1 %v126_v14 }
  0x27   :  { %275 = vmatprep.subr.mxu1 %v316_v0 }
  0x28   :  { %276 = vmatpush3.msra.mxu1 %v125_v15 }
  0x29   :  { %277 = vmatprep.subr.mxu1 %v316_v0 }
  0x2a   :  { %278 = vmatpush3.msra.mxu1 %v124_v16 }
  0x2b   :  { %279 = vmatprep.subr.mxu1 %v316_v0 }
  0x2c   :  { %280 = vmatpush3.msra.mxu1 %v123_v17 }
  0x2d   :  { %281 = vmatprep.subr.mxu1 %v316_v0 }
  0x2e   :  { %282 = vmatpush3.msra.mxu1 %v122_v18 }
  0xd1   :  { %v117_v20 = vpop.f32.mrf.mxu0 }
  0xd2   :  { %v118_v21 = vadd.f32 %v223_v19, %v117_v20 }
  0xd3   :  { %v250_v22 = vpop.f32.mrf.mxu0 }
  0xd4   :  { %v121_v23 = vmax.f32 %v118_v21, 0.0 }
  0xd6   :  { %284 = vmatmul.mubr.f32.vlgmr.msra.gmra.mxu1 %v121_v23 }
 0x196   :  { %v204_v25 = vpop.f32.mrf.mxu1 }
 0x197   :  { %v215_v26 = vadd.f32 %v226_v24, %v204_v25 }
 0x198   :  { %v285_v27 = vpop.f32.mrf.mxu1 }
 0x199   :  { %217 = vst.msk [vmem:[%s371_s5] sm:$0xff] %vm216_vm3, %v215_v26 }
 0x19a   :  { %222 = vsyncpa [#allocation3], 1 }

</bundles_post_ra>
